<compile_context>
chip_gen: v6e
topology: v6e:2x2x1
jax: 0.10.0
libtpu: 0.0.40
codegen_flags: <defaults>
</compile_context>

<pallas_src>
import functools

import jax
import jax.numpy as jnp
from jax.experimental import pallas as pl
from jax.experimental.pallas import tpu as pltpu


def _round_up(v, m):
    return ((v + m - 1) // m) * m


def _pad2(a, rows, cols):
    return jnp.pad(a, ((0, rows - a.shape[0]), (0, cols - a.shape[1])))


def _vmem_limit_bytes():
    """Per-generation VMEM budget (v5e/v6e: ~112 MiB, v7x: ~48 MiB)."""
    try:
        cap = int(pltpu.get_tpu_info().vmem_capacity_bytes)
        return int(min(max(cap - 16 * 1024 * 1024, 32 * 1024 * 1024),
                       112 * 1024 * 1024))
    except Exception:
        return 48 * 1024 * 1024  # conservative, always safe


def _block_spec(block_shape, index_map, buffers=None):
    """BlockSpec with optional deeper pipelining; falls back cleanly if the
    running JAX version does not expose the pipeline_mode kwarg."""
    if buffers is not None:
        try:
            return pl.BlockSpec(block_shape, index_map,
                                pipeline_mode=pl.Buffered(buffers))
        except Exception:
            pass
    return pl.BlockSpec(block_shape, index_map)


# ---------------------------------------------------------------------------
# Kernels
# ---------------------------------------------------------------------------
def _proj_cat_kernel(x_ref, w_ref, b_ref, o_ref):
    """pcat = x @ [Wl | Wr] + [0 | b]   (bf16 operands, f32 accumulate, bf16 out)."""
    p = jnp.dot(x_ref[...], w_ref[...], preferred_element_type=jnp.float32)
    o_ref[...] = (p + b_ref[...]).astype(o_ref.dtype)


def _proj_skip_cat_kernel(h_ref, x_ref, wsk_ref, w_ref, b_ref, o_ref):
    """xin = h_sum + x @ Wskip ;  pcat = xin @ [Wl | Wr] + [0 | b]."""
    xin = h_ref[...] + jnp.dot(x_ref[...], wsk_ref[...],
                               preferred_element_type=jnp.float32)
    p = jnp.dot(xin.astype(jnp.bfloat16), w_ref[...],
                preferred_element_type=jnp.float32)
    o_ref[...] = (p + b_ref[...]).astype(o_ref.dtype)


def _agg_prelu_kernel(a_ref, xw_ref, zr_ref, inv_deg_ref, alpha_ref, o_ref, *,
                      double_prelu):
    """out = PReLU( (A_counts @ XW) * inv_deg + ZR );  k-reduction accumulated
    directly in the (VMEM-resident) output block — no scratch."""
    k = pl.program_id(1)

    @pl.when(k == 0)
    def _():
        o_ref[...] = jnp.zeros_like(o_ref)

    o_ref[...] += jnp.dot(a_ref[...], xw_ref[...],
                          preferred_element_type=jnp.float32)

    @pl.when(k == pl.num_programs(1) - 1)
    def _():
        z = o_ref[...] * inv_deg_ref[...] + zr_ref[...].astype(jnp.float32)
        alpha = alpha_ref[...]
        h = jnp.where(z >= 0.0, z, alpha * z)
        if double_prelu:  # h_l[0] = act0(act0(conv0(x))) — keep the two-step form
            h = jnp.where(h >= 0.0, h, alpha * h)
        o_ref[...] = h


# ---------------------------------------------------------------------------
# pallas_call wrappers
# ---------------------------------------------------------------------------
def _proj_cat(x_p, wcat, bcat, *, tm, vmem_limit):
    n_pad, f_in = x_p.shape
    two_fo = wcat.shape[1]
    flops = 2 * n_pad * f_in * two_fo
    bytes_acc = (x_p.size + wcat.size + n_pad * two_fo) * 2 + bcat.size * 4
    return pl.pallas_call(
        _proj_cat_kernel,
        out_shape=jax.ShapeDtypeStruct((n_pad, two_fo), jnp.bfloat16),
        grid=(n_pad // tm,),
        in_specs=[
            pl.BlockSpec((tm, f_in), lambda i: (i, 0)),
            pl.BlockSpec((f_in, two_fo), lambda i: (0, 0)),
            pl.BlockSpec((1, two_fo), lambda i: (0, 0)),
        ],
        out_specs=pl.BlockSpec((tm, two_fo), lambda i: (i, 0)),
        compiler_params=pltpu.CompilerParams(
            dimension_semantics=("parallel",), vmem_limit_bytes=vmem_limit),
        cost_estimate=pl.CostEstimate(flops=flops, transcendentals=0,
                                      bytes_accessed=bytes_acc),
    )(x_p, wcat, bcat)


def _proj_skip_cat(h_sum, x_p, wsk, wcat, bcat, *, tm, vmem_limit):
    n_pad, f_hid = h_sum.shape
    f_in = x_p.shape[1]
    two_fo = wcat.shape[1]
    flops = 2 * n_pad * f_in * f_hid + 2 * n_pad * f_hid * two_fo
    bytes_acc = (h_sum.size * 4 + x_p.size * 2 + wsk.size * 2 + wcat.size * 2
                 + bcat.size * 4 + n_pad * two_fo * 2)
    return pl.pallas_call(
        _proj_skip_cat_kernel,
        out_shape=jax.ShapeDtypeStruct((n_pad, two_fo), jnp.bfloat16),
        grid=(n_pad // tm,),
        in_specs=[
            pl.BlockSpec((tm, f_hid), lambda i: (i, 0)),
            pl.BlockSpec((tm, f_in), lambda i: (i, 0)),
            pl.BlockSpec((f_in, f_hid), lambda i: (0, 0)),
            pl.BlockSpec((f_hid, two_fo), lambda i: (0, 0)),
            pl.BlockSpec((1, two_fo), lambda i: (0, 0)),
        ],
        out_specs=pl.BlockSpec((tm, two_fo), lambda i: (i, 0)),
        compiler_params=pltpu.CompilerParams(
            dimension_semantics=("parallel",), vmem_limit_bytes=vmem_limit),
        cost_estimate=pl.CostEstimate(flops=flops, transcendentals=0,
                                      bytes_accessed=bytes_acc),
    )(h_sum, x_p, wsk, wcat, bcat)


def _sage_aggregate(a_bf16, pcat, inv_deg, alpha, *, tm, tk, double_prelu,
                    vmem_limit):
    n_pad = a_bf16.shape[0]
    f_out = pcat.shape[1] // 2
    grid = (n_pad // tm, n_pad // tk)
    flops = 2 * n_pad * n_pad * f_out
    bytes_acc = (a_bf16.size * 2 + grid[0] * n_pad * f_out * 2   # A + re-streamed XW
                 + n_pad * f_out * 2                              # root half of pcat
                 + inv_deg.size * 4 + alpha.size * 4
                 + n_pad * f_out * 4)                             # output
    kernel = functools.partial(_agg_prelu_kernel, double_prelu=double_prelu)
    return pl.pallas_call(
        kernel,
        out_shape=jax.ShapeDtypeStruct((n_pad, f_out), jnp.float32),
        grid=grid,
        in_specs=[
            _block_spec((tm, tk), lambda i, k: (i, k), buffers=3),  # A counts (bf16)
            pl.BlockSpec((tk, f_out), lambda i, k: (k, 0)),  # XW half of pcat
            pl.BlockSpec((tm, f_out), lambda i, k: (i, 1)),  # root half of pcat
            pl.BlockSpec((tm, 1), lambda i, k: (i, 0)),      # 1 / in-degree
            pl.BlockSpec((1, f_out), lambda i, k: (0, 0)),   # PReLU alpha
        ],
        out_specs=pl.BlockSpec((tm, f_out), lambda i, k: (i, 0)),
        compiler_params=pltpu.CompilerParams(
            dimension_semantics=("parallel", "arbitrary"),
            vmem_limit_bytes=vmem_limit),
        cost_estimate=pl.CostEstimate(flops=flops, transcendentals=0,
                                      bytes_accessed=bytes_acc),
    )(a_bf16, pcat, pcat, inv_deg, alpha)


# ---------------------------------------------------------------------------
# Glue: adjacency (counts, bf16) + inverse degree, padding, forward
# ---------------------------------------------------------------------------
def build_adjacency(edge_index, n_pad):
    """Unnormalized in-edge count matrix A[i, j] = #edges j->i (bf16) and
    1/in-degree column (f32). Mean normalization happens inside the
    aggregation kernel as (A @ XW) * inv_deg, so exactly one N^2 array
    (bf16) is materialized and no N^2 divide/where passes run in XLA."""
    # TODO(synk): bf16 counts saturate above 256 parallel edges per (dst, src) pair.
    src = edge_index[0]
    dst = edge_index[1]
    adj = jnp.zeros((n_pad, n_pad), jnp.bfloat16).at[dst, src].add(1.0)
    deg = jnp.zeros((n_pad,), jnp.float32).at[dst].add(1.0)
    inv_deg = jnp.where(deg > 0.0, 1.0 / jnp.maximum(deg, 1.0), 0.0)
    return adj, inv_deg.reshape(n_pad, 1)


def sage_encoder_forward(x, edge_index, edge_weight, params, num_layers=2,
                         block=512):
    # edge_weight is unused, matching the reference forward (SAGEConv called
    # without edge_weight).
    del edge_weight

    n, f_in = x.shape
    hidden = params["convs"][0][0].shape[1]
    emb = params["convs"][-1][0].shape[1]

    # Clamp the tile to the (128-rounded) problem size: small graphs pad to a
    # single 128-row block instead of lcm(block_m, block_k).
    blk = min(block, _round_up(n, 128))
    n_pad = _round_up(n, blk)
    f_in_p = _round_up(f_in, 128)
    hid_p = _round_up(hidden, 128)
    vmem_limit = _vmem_limit_bytes()

    a_bf16, inv_deg = build_adjacency(edge_index, n_pad)
    x_bf16 = _pad2(x, n_pad, f_in_p).astype(jnp.bfloat16)

    def cat_w(wl, wr, fi_p, fo_p):
        return jnp.concatenate([_pad2(wl, fi_p, fo_p), _pad2(wr, fi_p, fo_p)],
                               axis=1).astype(jnp.bfloat16)

    def cat_b(b, fo_p):
        return jnp.concatenate([jnp.zeros((1, fo_p), jnp.float32),
                                _pad2(b, 1, fo_p)], axis=1)

    # ---- layer 0 -----------------------------------------------------------
    wl0, wr0, b0 = params["convs"][0]
    pcat0 = _proj_cat(x_bf16, cat_w(wl0, wr0, f_in_p, hid_p), cat_b(b0, hid_p),
                      tm=blk, vmem_limit=vmem_limit)
    h = _sage_aggregate(a_bf16, pcat0, inv_deg,
                        _pad2(params["alphas"][0], 1, hid_p),
                        tm=blk, tk=blk, double_prelu=True,
                        vmem_limit=vmem_limit)
    h_l = [h]

    # ---- layers 1 .. L-1 ---------------------------------------------------
    wskip_bf16 = _pad2(params["skip"], f_in_p, hid_p).astype(jnp.bfloat16)
    for l in range(1, num_layers):
        wl, wr, b = params["convs"][l]
        fo_p = _round_up(wl.shape[1], 128)

        h_sum = h_l[0]
        for t in h_l[1:]:
            h_sum = h_sum + t

        pcat = _proj_skip_cat(h_sum, x_bf16, wskip_bf16,
                              cat_w(wl, wr, hid_p, fo_p), cat_b(b, fo_p),
                              tm=blk, vmem_limit=vmem_limit)
        h = _sage_aggregate(a_bf16, pcat, inv_deg,
                            _pad2(params["alphas"][l], 1, fo_p),
                            tm=blk, tk=blk, double_prelu=False,
                            vmem_limit=vmem_limit)
        h_l.append(h)

    return h[:n, :emb]


# ---------------------------------------------------------------------------
# Deterministic parameter construction (PyTorch-style uniform init bounds)
# ---------------------------------------------------------------------------
def init_params(key, input_size, hidden_size, embedding_size, num_layers=2):
    def lin(key, fan_in, fan_out, bias):
        kw, kb = jax.random.split(key)
        bound = 1.0 / jnp.sqrt(jnp.float32(fan_in))
        # stored pre-transposed: [fan_in, fan_out]
        w = jax.random.uniform(kw, (fan_in, fan_out), jnp.float32, -bound, bound)
        b = (jax.random.uniform(kb, (1, fan_out), jnp.float32, -bound, bound)
             if bias else None)
        return w, b

    sizes = []
    for l in range(num_layers):
        fin = input_size if l == 0 else hidden_size
        fout = embedding_size if l == num_layers - 1 else hidden_size
        sizes.append((fin, fout))

    keys = jax.random.split(key, num_layers * 2 + 1)
    convs = []
    for l, (fin, fout) in enumerate(sizes):
        wl, b = lin(keys[2 * l], fin, fout, bias=True)        # lin_l (neighbors)
        wr, _ = lin(keys[2 * l + 1], fin, fout, bias=False)   # lin_r (root)
        convs.append((wl, wr, b))

    # the reference shares ONE skip Linear across layers ([Linear]*(L-1))
    wskip, _ = lin(keys[-1], input_size, hidden_size, bias=False)

    alphas = []
    for l in range(num_layers):
        fout = embedding_size if l == num_layers - 1 else hidden_size
        alphas.append(jnp.full((1, fout), 0.25, jnp.float32))  # nn.PReLU(fout)

    return {"convs": convs, "skip": wskip, "alphas": alphas}


# ---------------------------------------------------------------------------
if __name__ == "__main__":
    NUM_NODES = 8
    NUM_EDGES = 24
    INPUT_SIZE = 16
    HIDDEN_SIZE = 32
    EMBEDDING_SIZE = 16
    NUM_LAYERS = 2

    key = jax.random.PRNGKey(0)
    k_x, k_e, k_w, k_p = jax.random.split(key, 4)

    x = jax.random.normal(k_x, (NUM_NODES, INPUT_SIZE), jnp.float32)
    edge_index = jax.random.randint(k_e, (2, NUM_EDGES), 0, NUM_NODES,
                                    dtype=jnp.int32)
    edge_weight = jax.random.uniform(k_w, (NUM_EDGES,), jnp.float32)

    params = init_params(k_p, INPUT_SIZE, HIDDEN_SIZE, EMBEDDING_SIZE,
                         NUM_LAYERS)

    out = sage_encoder_forward(x, edge_index, edge_weight, params,
                               num_layers=NUM_LAYERS)
    out = jax.block_until_ready(out)

    assert out.shape == (NUM_NODES, EMBEDDING_SIZE), out.shape
    assert out.dtype == jnp.float32
    assert bool(jnp.all(jnp.isfinite(out)))
    print("KERNEL_OK")
</pallas_src>

<mosaic_0001>
module attributes {stable_mosaic.version = 11 : i64} {
  func.func @_proj_cat_kernel(%arg0: i32, %arg1: memref<128x128xbf16, #tpu.memory_space<vmem>>, %arg2: memref<128x256xbf16, #tpu.memory_space<vmem>>, %arg3: memref<1x256xf32, #tpu.memory_space<vmem>>, %arg4: memref<128x256xbf16, #tpu.memory_space<vmem>>) attributes {dimension_semantics = [#tpu.dimension_semantics<parallel>], iteration_bounds = array<i64: 1>, scalar_prefetch = 0 : i64, scratch_operands = 0 : i64, tpu.core_type = #tpu.core_type<tc>, window_params = [{transform_indices = @transform_0, window_bounds = array<i64: 128, 128>}, {pipeline_mode = #tpu.pipeline_mode<synchronous>, transform_indices = @transform_1, window_bounds = array<i64: 128, 256>}, {pipeline_mode = #tpu.pipeline_mode<synchronous>, transform_indices = @transform_2, window_bounds = array<i64: 1, 256>}, {transform_indices = @transform_3, window_bounds = array<i64: 128, 256>}]} {
    %c0 = arith.constant 0 : index
    %c0_0 = arith.constant 0 : index
    %0 = vector.load %arg1[%c0, %c0_0] : memref<128x128xbf16, #tpu.memory_space<vmem>>, vector<128x128xbf16>
    %c0_1 = arith.constant 0 : index
    %c0_2 = arith.constant 0 : index
    %1 = vector.load %arg2[%c0_1, %c0_2] : memref<128x256xbf16, #tpu.memory_space<vmem>>, vector<128x256xbf16>
    %cst = arith.constant dense<0.000000e+00> : vector<128x256xf32>
    %2 = tpu.matmul %0, %1, %cst {dimension_numbers = #tpu.dot_dimension_numbers<[1], [0], [0], [1], [0, 0, 1, 1], [], []>} : vector<128x128xbf16>, vector<128x256xbf16>, vector<128x256xf32> -> vector<128x256xf32>
    %c0_3 = arith.constant 0 : index
    %c0_4 = arith.constant 0 : index
    %3 = vector.load %arg3[%c0_3, %c0_4] : memref<1x256xf32, #tpu.memory_space<vmem>>, vector<1x256xf32>
    %4 = vector.broadcast %3 : vector<1x256xf32> to vector<128x256xf32>
    %5 = arith.addf %2, %4 : vector<128x256xf32>
    %6 = arith.truncf %5 : vector<128x256xf32> to vector<128x256xbf16>
    %c0_5 = arith.constant 0 : index
    %c0_6 = arith.constant 0 : index
    %7 = vector.load %arg4[%c0_5, %c0_6] : memref<128x256xbf16, #tpu.memory_space<vmem>>, vector<128x256xbf16>
    tpu.vector_store %arg4[%c0_5, %c0_6], %6 {strides = array<i32>} : memref<128x256xbf16, #tpu.memory_space<vmem>>, vector<128x256xbf16>,
    return
  }
  func.func @transform_0(%arg0: i32) -> (i32, i32) {
    %c0_i32 = arith.constant 0 : i32
    %c0_i32_0 = arith.constant 0 : i32
    return %arg0, %c0_i32 : i32, i32
  }
  func.func @transform_1(%arg0: i32) -> (i32, i32) {
    %c0_i32 = arith.constant 0 : i32
    %c0_i32_0 = arith.constant 0 : i32
    %c0_i32_1 = arith.constant 0 : i32
    return %c0_i32, %c0_i32_0 : i32, i32
  }
  func.func @transform_2(%arg0: i32) -> (i32, i32) {
    %c0_i32 = arith.constant 0 : i32
    %c0_i32_0 = arith.constant 0 : i32
    %c0_i32_1 = arith.constant 0 : i32
    return %c0_i32, %c0_i32_0 : i32, i32
  }
  func.func @transform_3(%arg0: i32) -> (i32, i32) {
    %c0_i32 = arith.constant 0 : i32
    %c0_i32_0 = arith.constant 0 : i32
    return %arg0, %c0_i32 : i32, i32
  }
}

</mosaic_0001>

<bundles_post_ra>
// kernel: tpu_custom_call.1
= control target key start
LH: loop header
LB: loop body
LE: loop exit
PB: predicated region body
PF: predicated region fallthrough
CT: control target
= control target key end

     0   :  { %8 = vsyncpa [#allocation3], 0  ;;  %s727_s0 = inlined_call_operand.hbm [shape: bf16[128,128], index: 0, kind: input, shape index: {}]   ;;  %s728_s1 = inlined_call_operand.hbm [shape: bf16[128,256], index: 1, kind: input, shape index: {}]   ;;  %s729_s2 = inlined_call_operand.vmem [shape: f32[1,256], index: 2, kind: input, shape index: {}]   ;;  %s730_s3 = inlined_call_operand.hbm [shape: bf16[128,256], index: 3, kind: output, shape index: {}]  }
   0x1   :  { %9 = vsyncpa [#allocation6], 0 }
   0x2   :  { %10 = vsyncpa [#allocation4], 0  ;;  %s637_s12 = smov [#allocation2]  }
   0x3   :  { %s16_s13 = sshll.u32 %s637_s12, 4  ;;  %s17_s13 = int_to_ptr.vmem [resolvable:$true] %s16_s13 }
   0x4   :  { %s579_s14 = scalar_lea.vmem %s17_s13, 1024  ;;  %p584_p1 = scmp.lt.s32.totalorder %s17_s13, %s17_s13 }
   0x5   :  { %p580_p0 = scmp.ne.s32.totalorder %s17_s13, %s579_s14  ;;  %p585_p2 = scmp.lt.s32.totalorder %s579_s14, %s579_s14 }
   0x7   :  { %p586_p3 = por %p585_p2, %p584_p1 }
   0x9   :  { %p587_p4 = pnand %p586_p3, %p580_p0 }
   0xb   :  { %590 = shalt.err (!%p587_p4)
}
   0xc   :  { %s638_s15 = smov 64   ;;  %s639_s16 = smov 4  }
   0xd   :  { %22 = dma.hbm_to_vmem [thread:$0]  %s727_s0, 1024, %s17_s13, [#allocation3], %s638_s15, %s638_s15, %s639_s16  }
   0xe   :  { %s640_s19 = smov [#allocation5]  }
   0xf   :  { %s28_s20 = sshll.u32 %s640_s19, 4  ;;  %s29_s20 = int_to_ptr.vmem [resolvable:$true] %s28_s20 }
  0x10   :  { %s599_s21 = scalar_lea.vmem %s29_s20, 2048  ;;  %p604_p6 = scmp.lt.s32.totalorder %s29_s20, %s29_s20 }
  0x11   :  { %p600_p5 = scmp.ne.s32.totalorder %s29_s20, %s599_s21  ;;  %p605_p7 = scmp.lt.s32.totalorder %s599_s21, %s599_s21 }
  0x13   :  { %p606_p8 = por %p605_p7, %p604_p6 }
  0x15   :  { %p607_p9 = pnand %p606_p8, %p600_p5 }
  0x17   :  { %610 = shalt.err (!%p607_p9)
}
  0x18   :  { %s641_s22 = smov 128   ;;  %s642_s23 = smov 8  }
  0x19   :  { %34 = dma.hbm_to_vmem [thread:$0]  %s728_s1, 2048, %s29_s20, [#allocation6], %s641_s22, %s641_s22, %s642_s23  }
  0x1a   :  { %631 = dma.done.wait [#allocation3], 1024  }
  0x1b   :  { %632 = vsyncadd [#allocation3], 4294966272 }
  0x1c   :  { %633 = dma.done.wait [#allocation6], 2048  }
  0x1d   :  { %634 = vsyncadd [#allocation6], 4294965248  ;;  %v643_v0 = vmov 0   ;;  %v539_v1 = vld [vmem:[#allocation5 + $0x74] ss:$8 sps:$4 sm:$0xff]   ;;  %v563_v17 = vld [vmem:[#allocation2] sm:$0xff]   ;;  %v78_v25 = vlaneseq }
  0x1e   :  { %248 = vmatprep.mubr.bf16.mxu0 %v643_v0  ;;  %288 = vmatprep.mubr.bf16.mxu1 %v643_v0  ;;  %v541_v2 = vld [vmem:[#allocation5 + $0x70] ss:$8 sps:$4 sm:$0xff]   ;;  %v542_v3 = vld [vmem:[#allocation5 + $0x64] ss:$8 sps:$4 sm:$0xff]   ;;  %v544_v4 = vld [vmem:[#allocation5 + $0x60] ss:$8 sps:$4 sm:$0xff]  }
  0x1f   :  { %216 = vmatprep.subr.bf16.mxu0 %v539_v1  ;;  %515 = vmatprep.subr.bf16.mxu1 %v539_v1  ;;  %v545_v5 = vld [vmem:[#allocation5 + $0x54] ss:$8 sps:$4 sm:$0xff]   ;;  %v547_v6 = vld [vmem:[#allocation5 + $0x50] ss:$8 sps:$4 sm:$0xff]   ;;  %v548_v7 = vld [vmem:[#allocation5 + $0x44] ss:$8 sps:$4 sm:$0xff]  }
  0x20   :  { %217 = vmatpush1.bf16.msra.mxu0 %v541_v2  ;;  %523 = vmatpush1.bf16.msra.mxu1 %v541_v2  ;;  %v550_v8 = vld [vmem:[#allocation5 + $0x40] ss:$8 sps:$4 sm:$0xff]   ;;  %v551_v9 = vld [vmem:[#allocation5 + $0x34] ss:$8 sps:$4 sm:$0xff]   ;;  %v553_v10 = vld [vmem:[#allocation5 + $0x30] ss:$8 sps:$4 sm:$0xff]  }
  0x21   :  { %218 = vmatprep.subr.bf16.mxu0 %v542_v3  ;;  %516 = vmatprep.subr.bf16.mxu1 %v542_v3  ;;  %v554_v11 = vld [vmem:[#allocation5 + $0x24] ss:$8 sps:$4 sm:$0xff]   ;;  %v556_v12 = vld [vmem:[#allocation5 + $0x20] ss:$8 sps:$4 sm:$0xff]   ;;  %v557_v13 = vld [vmem:[#allocation5 + $0x14] ss:$8 sps:$4 sm:$0xff]  }
  0x22   :  { %v559_v14 = vld [vmem:[#allocation5 + $0x10] ss:$8 sps:$4 sm:$0xff]   ;;  %v560_v15 = vld [vmem:[#allocation5 + $0x4] ss:$8 sps:$4 sm:$0xff]   ;;  %v562_v16 = vld [vmem:[#allocation5] ss:$8 sps:$4 sm:$0xff]  }
  0x23   :  { %v564_v18 = vld [vmem:[#allocation2 + $0x20] sm:$0xff]   ;;  %v565_v19 = vld [vmem:[#allocation2 + $0x8] sm:$0xff]   ;;  %v567_v21 = vld [vmem:[#allocation2 + $0x10] sm:$0xff]   ;;  %v79_v26 = vshrl.u32 %v78_v25, 7 }
  0x24   :  { %219 = vmatpush1.bf16.msra.mxu0 %v544_v4  ;;  %524 = vmatpush1.bf16.msra.mxu1 %v544_v4  ;;  %v566_v20 = vld [vmem:[#allocation2 + $0x28] sm:$0xff]   ;;  %v568_v22 = vld [vmem:[#allocation2 + $0x30] sm:$0xff]   ;;  %v569_v23 = vld [vmem:[#allocation2 + $0x18] sm:$0xff]  }
  0x25   :  { %220 = vmatprep.subr.bf16.mxu0 %v545_v5  ;;  %517 = vmatprep.subr.bf16.mxu1 %v545_v5  ;;  %v570_v24 = vld [vmem:[#allocation2 + $0x38] sm:$0xff]   ;;  %v80_v27 = vsub.s32 0, %v79_v26  ;;  %v84_v28 = vsub.s32 1, %v79_v26  ;;  %v76_v29 = vld [vmem:[%s729_s2] sm:$0x3]  ;;  %s644_s2 = smov [#allocation7]  }
  0x26   :  { %s446_s26 = sshll.u32 %s644_s2, 4  ;;  %s447_s26 = int_to_ptr.vmem [resolvable:$true] %s446_s26 }
  0x27   :  { %v685_v30 = vrot.slane %v76_v29, %v80_v27  ;;  %v687_v31 = vrot.slane %v76_v29, %v84_v28  ;;  %s611_s27 = scalar_lea.vmem %s447_s26, 2048  ;;  %p616_p11 = scmp.lt.s32.totalorder %s447_s26, %s447_s26 }
  0x28   :  { %221 = vmatpush1.bf16.msra.mxu0 %v547_v6  ;;  %525 = vmatpush1.bf16.msra.mxu1 %v547_v6  ;;  %p612_p10 = scmp.ne.s32.totalorder %s447_s26, %s611_s27  ;;  %p617_p12 = scmp.lt.s32.totalorder %s611_s27, %s611_s27 }
  0x29   :  { %222 = vmatprep.subr.bf16.mxu0 %v548_v7  ;;  %518 = vmatprep.subr.bf16.mxu1 %v548_v7 }
  0x2a   :  { %p618_p13 = por %p617_p12, %p616_p11 }
  0x2c   :  { %223 = vmatpush1.bf16.msra.mxu0 %v550_v8  ;;  %526 = vmatpush1.bf16.msra.mxu1 %v550_v8  ;;  %p619_p0 = pnand %p618_p13, %p612_p10 }
  0x2d   :  { %224 = vmatprep.subr.bf16.mxu0 %v551_v9  ;;  %519 = vmatprep.subr.bf16.mxu1 %v551_v9 }
  0x30   :  { %225 = vmatpush1.bf16.msra.mxu0 %v553_v10  ;;  %527 = vmatpush1.bf16.msra.mxu1 %v553_v10 }
  0x31   :  { %226 = vmatprep.subr.bf16.mxu0 %v554_v11  ;;  %520 = vmatprep.subr.bf16.mxu1 %v554_v11 }
  0x34   :  { %227 = vmatpush1.bf16.msra.mxu0 %v556_v12  ;;  %528 = vmatpush1.bf16.msra.mxu1 %v556_v12 }
  0x35   :  { %228 = vmatprep.subr.bf16.mxu0 %v557_v13  ;;  %521 = vmatprep.subr.bf16.mxu1 %v557_v13 }
  0x38   :  { %229 = vmatpush1.bf16.msra.mxu0 %v559_v14  ;;  %529 = vmatpush1.bf16.msra.mxu1 %v559_v14 }
  0x39   :  { %230 = vmatprep.subr.bf16.mxu0 %v560_v15  ;;  %522 = vmatprep.subr.bf16.mxu1 %v560_v15 }
  0x3c   :  { %231 = vmatpush1.bf16.msra.mxu0 %v562_v16  ;;  %530 = vmatpush1.bf16.msra.mxu1 %v562_v16 }
  0x3f   :  { %249 = vmatmul.mubr.bf16.vlgmr.msra.gmra.mxu0 %v563_v17  ;;  %289 = vmatmul.mubr.bf16.vlgmr.msra.gmra.mxu1 %v564_v18 }
  0x40   :  { %258 = vmatprep.mubr.bf16.mxu0 %v643_v0  ;;  %298 = vmatprep.mubr.bf16.mxu1 %v643_v0 }
  0x47   :  { %259 = vmatmul.mubr.bf16.gmra.mxu0 %v565_v19  ;;  %299 = vmatmul.mubr.bf16.gmra.mxu1 %v566_v20 }
  0x48   :  { %268 = vmatprep.mubr.bf16.mxu0 %v643_v0  ;;  %308 = vmatprep.mubr.bf16.mxu1 %v643_v0 }
  0x4f   :  { %269 = vmatmul.mubr.bf16.gmra.mxu0 %v567_v21  ;;  %309 = vmatmul.mubr.bf16.gmra.mxu1 %v568_v22 }
  0x50   :  { %278 = vmatprep.mubr.bf16.mxu0 %v643_v0  ;;  %318 = vmatprep.mubr.bf16.mxu1 %v643_v0 }
  0x57   :  { %279 = vmatmul.mubr.bf16.gmra.mxu0 %v569_v23  ;;  %319 = vmatmul.mubr.bf16.gmra.mxu1 %v570_v24 }
  0xff   :  { %v250_v32 = vpop.f32.mrf.mxu0  ;;  %v290_v33 = vpop.f32.mrf.mxu1 }
 0x100   :  { %v251_v36 = vadd.f32 %v250_v32, %v685_v30  ;;  %v291_v37 = vadd.f32 %v290_v33, %v685_v30 }
 0x101   :  { %v252_v34 = vpop.f32.mrf.mxu0  ;;  %v292_v35 = vpop.f32.mrf.mxu1 }
 0x102   :  { %v253_v38 = vadd.f32 %v252_v34, %v687_v31  ;;  %v293_v39 = vadd.f32 %v292_v35, %v687_v31 }
 0x103   :  { %v254_v40 = vpop.f32.mrf.mxu0  ;;  %v294_v41 = vpop.f32.mrf.mxu1 }
 0x104   :  { %v499_v42 = vpack.c.bf16 %v253_v38, %v251_v36  ;;  %v507_v43 = vpack.c.bf16 %v293_v39, %v291_v37  ;;  %v255_v46 = vadd.f32 %v254_v40, %v685_v30  ;;  %v295_v47 = vadd.f32 %v294_v41, %v685_v30 }
 0x105   :  { %v256_v44 = vpop.f32.mrf.mxu0  ;;  %v296_v45 = vpop.f32.mrf.mxu1 }
 0x106   :  { %425 = vst [vmem:[#allocation7] sm:$0xff] %v499_v42  ;;  %433 = vst [vmem:[#allocation7 + $0x40] sm:$0xff] %v507_v43  ;;  %v257_v48 = vadd.f32 %v256_v44, %v687_v31  ;;  %v297_v49 = vadd.f32 %v296_v45, %v687_v31 }
 0x107   :  { %v260_v50 = vpop.f32.mrf.mxu0  ;;  %v300_v51 = vpop.f32.mrf.mxu1 }
 0x108   :  { %v500_v52 = vpack.c.bf16 %v257_v48, %v255_v46  ;;  %v508_v53 = vpack.c.bf16 %v297_v49, %v295_v47  ;;  %v261_v56 = vadd.f32 %v260_v50, %v685_v30  ;;  %v301_v57 = vadd.f32 %v300_v51, %v685_v30 }
 0x109   :  { %v262_v54 = vpop.f32.mrf.mxu0  ;;  %v302_v55 = vpop.f32.mrf.mxu1 }
 0x10a   :  { %426 = vst [vmem:[#allocation7 + $0x8] sm:$0xff] %v500_v52  ;;  %434 = vst [vmem:[#allocation7 + $0x48] sm:$0xff] %v508_v53  ;;  %v263_v58 = vadd.f32 %v262_v54, %v687_v31  ;;  %v303_v59 = vadd.f32 %v302_v55, %v687_v31 }
 0x10b   :  { %v264_v60 = vpop.f32.mrf.mxu0  ;;  %v304_v61 = vpop.f32.mrf.mxu1 }
 0x10c   :  { %v501_v62 = vpack.c.bf16 %v263_v58, %v261_v56  ;;  %v509_v63 = vpack.c.bf16 %v303_v59, %v301_v57  ;;  %v265_v2 = vadd.f32 %v264_v60, %v685_v30  ;;  %v305_v3 = vadd.f32 %v304_v61, %v685_v30 }
 0x10d   :  { %v266_v0 = vpop.f32.mrf.mxu0  ;;  %v306_v1 = vpop.f32.mrf.mxu1 }
 0x10e   :  { %427 = vst [vmem:[#allocation7 + $0x10] sm:$0xff] %v501_v62  ;;  %435 = vst [vmem:[#allocation7 + $0x50] sm:$0xff] %v509_v63  ;;  %v267_v4 = vadd.f32 %v266_v0, %v687_v31  ;;  %v307_v5 = vadd.f32 %v306_v1, %v687_v31 }
 0x10f   :  { %v270_v6 = vpop.f32.mrf.mxu0  ;;  %v310_v7 = vpop.f32.mrf.mxu1 }
 0x110   :  { %v502_v8 = vpack.c.bf16 %v267_v4, %v265_v2  ;;  %v510_v9 = vpack.c.bf16 %v307_v5, %v305_v3  ;;  %v271_v12 = vadd.f32 %v270_v6, %v685_v30  ;;  %v311_v13 = vadd.f32 %v310_v7, %v685_v30 }
 0x111   :  { %v272_v10 = vpop.f32.mrf.mxu0  ;;  %v312_v11 = vpop.f32.mrf.mxu1 }
 0x112   :  { %428 = vst [vmem:[#allocation7 + $0x18] sm:$0xff] %v502_v8  ;;  %436 = vst [vmem:[#allocation7 + $0x58] sm:$0xff] %v510_v9  ;;  %v273_v14 = vadd.f32 %v272_v10, %v687_v31  ;;  %v313_v15 = vadd.f32 %v312_v11, %v687_v31 }
 0x113   :  { %v274_v16 = vpop.f32.mrf.mxu0  ;;  %v314_v17 = vpop.f32.mrf.mxu1 }
 0x114   :  { %v503_v18 = vpack.c.bf16 %v273_v14, %v271_v12  ;;  %v511_v19 = vpack.c.bf16 %v313_v15, %v311_v13  ;;  %v275_v22 = vadd.f32 %v274_v16, %v685_v30  ;;  %v315_v23 = vadd.f32 %v314_v17, %v685_v30 }
 0x115   :  { %v276_v20 = vpop.f32.mrf.mxu0  ;;  %v316_v21 = vpop.f32.mrf.mxu1 }
 0x116   :  { %429 = vst [vmem:[#allocation7 + $0x20] sm:$0xff] %v503_v18  ;;  %437 = vst [vmem:[#allocation7 + $0x60] sm:$0xff] %v511_v19  ;;  %v277_v24 = vadd.f32 %v276_v20, %v687_v31  ;;  %v317_v25 = vadd.f32 %v316_v21, %v687_v31 }
 0x117   :  { %v280_v26 = vpop.f32.mrf.mxu0  ;;  %v320_v27 = vpop.f32.mrf.mxu1 }
 0x118   :  { %v504_v28 = vpack.c.bf16 %v277_v24, %v275_v22  ;;  %v512_v29 = vpack.c.bf16 %v317_v25, %v315_v23  ;;  %v281_v34 = vadd.f32 %v280_v26, %v685_v30  ;;  %v321_v35 = vadd.f32 %v320_v27, %v685_v30 }
 0x119   :  { %v282_v32 = vpop.f32.mrf.mxu0  ;;  %v322_v33 = vpop.f32.mrf.mxu1 }
 0x11a   :  { %430 = vst [vmem:[#allocation7 + $0x28] sm:$0xff] %v504_v28  ;;  %438 = vst [vmem:[#allocation7 + $0x68] sm:$0xff] %v512_v29  ;;  %v283_v36 = vadd.f32 %v282_v32, %v687_v31  ;;  %v323_v37 = vadd.f32 %v322_v33, %v687_v31 }
 0x11b   :  { %v284_v38 = vpop.f32.mrf.mxu0  ;;  %v324_v39 = vpop.f32.mrf.mxu1 }
 0x11c   :  { %v505_v40 = vpack.c.bf16 %v283_v36, %v281_v34  ;;  %v513_v41 = vpack.c.bf16 %v323_v37, %v321_v35  ;;  %v285_v44 = vadd.f32 %v284_v38, %v685_v30  ;;  %v325_v45 = vadd.f32 %v324_v39, %v685_v30 }
 0x11d   :  { %v286_v42 = vpop.f32.mrf.mxu0  ;;  %v326_v43 = vpop.f32.mrf.mxu1 }
 0x11e   :  { %431 = vst [vmem:[#allocation7 + $0x30] sm:$0xff] %v505_v40  ;;  %439 = vst [vmem:[#allocation7 + $0x70] sm:$0xff] %v513_v41  ;;  %v287_v46 = vadd.f32 %v286_v42, %v687_v31  ;;  %v327_v47 = vadd.f32 %v326_v43, %v687_v31 }
 0x120   :  { %v506_v48 = vpack.c.bf16 %v287_v46, %v285_v44  ;;  %v514_v49 = vpack.c.bf16 %v327_v47, %v325_v45 }
 0x122   :  { %432 = vst [vmem:[#allocation7 + $0x38] sm:$0xff] %v506_v48  ;;  %440 = vst [vmem:[#allocation7 + $0x78] sm:$0xff] %v514_v49 }
 0x123   :  { %622 = shalt.err (!%p619_p0)
}
 0x124   :  { %452 = dma.vmem_to_hbm [thread:$0]  %s447_s26, 2048, %s730_s3, [#allocation4], %s641_s22, %s641_s22, %s642_s23  }
 0x125   :  { %635 = dma.done.wait [#allocation4], 2048  }
 0x126   :  { %636 = vsyncadd [#allocation4], 4294965248 }
 0x127   :  { %456 = vsyncpa [#allocation3], 1 }
 0x128   :  { %457 = vsyncpa [#allocation6], 1 }
 0x129   :  { %458 = vsyncpa [#allocation4], 1 }

</bundles_post_ra>
